<compile_context>
chip_gen: v5e
topology: v5e:2x2
jax: 0.10.0
libtpu: 0.0.40
codegen_flags: <defaults>
</compile_context>

<pallas_src>
import functools

import jax
import jax.numpy as jnp
from jax import lax
from jax.experimental import pallas as pl
from jax.experimental.pallas import tpu as pltpu

EPS = 1e-4        # module default eps
MOMENTUM = 0.1    # module default momentum
GAMMA_INIT = 1.0  # module default gamma_init

_VMEM_LIMIT_BYTES = 32 * 1024 * 1024  # safe on v5e/v6e/v7x, above scoped defaults


def _qbn_reduce_kernel(x_ref, gamma_ref, rmean_ref, rvar_ref,
                       scale_ref, new_rmean_ref, new_rvar_ref,
                       sum_ref, sumsq_ref, *, n_total, momentum, eps):
    """Pass 1: accumulate per-channel sum / sum-of-squares over batch tiles.

    At the last grid step, finalize:
      quat_var = sum over the 4 quaternion components of per-channel variance
      scale    = gamma * rsqrt(quat_var + eps), tiled once to (1, C)
      new running stats (EMA).
    """
    step = pl.program_id(0)

    @pl.when(step == 0)
    def _init():
        sum_ref[...] = jnp.zeros_like(sum_ref)
        sumsq_ref[...] = jnp.zeros_like(sumsq_ref)

    x = x_ref[...].astype(jnp.float32)                       # (TN, C)
    sum_ref[...] += jnp.sum(x, axis=0, keepdims=True)        # (1, C)
    sumsq_ref[...] += jnp.sum(x * x, axis=0, keepdims=True)  # (1, C)

    @pl.when(step == pl.num_programs(0) - 1)
    def _finalize():
        inv_n = 1.0 / n_total
        mu = sum_ref[...] * inv_n                            # (1, C)
        # E[x^2] - mu^2 in f32 accumulation; fine for activation-scale data.
        # TODO(synk): for very large-mean inputs a two-read centered variance
        # would be numerically safer.
        var_c = sumsq_ref[...] * inv_n - mu * mu             # (1, C)
        f = var_c.shape[-1] // 4
        quat_var = (var_c[:, 0 * f:1 * f] + var_c[:, 1 * f:2 * f]
                    + var_c[:, 2 * f:3 * f] + var_c[:, 3 * f:4 * f])   # (1, F)
        scale_f = gamma_ref[...] * lax.rsqrt(quat_var + eps)           # (1, F)
        # One-time lane concat (runs once per call, NOT in the per-element path).
        scale_ref[...] = jnp.concatenate([scale_f] * 4, axis=-1)       # (1, C)
        new_rmean_ref[...] = (1.0 - momentum) * rmean_ref[...] + momentum * mu
        new_rvar_ref[...] = (1.0 - momentum) * rvar_ref[...] + momentum * quat_var


def _qbn_normalize_kernel(scale_ref, beta_ref, x_ref, out_ref):
    """Pass 2: out = x * scale + beta (per-channel fused scale, VALU-only)."""
    out_ref[...] = (x_ref[...].astype(jnp.float32) * scale_ref[...]
                    + beta_ref[...]).astype(out_ref.dtype)


def _choose_tile_rows(n, c, itemsize, target_bytes=1 << 20, max_rows=1024):
    """Largest multiple-of-8 divisor of n whose (rows, C) block is ~<= 1 MiB."""
    if n % 8 != 0:
        return n  # full-array block (block_shape == array shape is allowed)
    target_rows = max(8, min(max_rows, target_bytes // max(1, c * itemsize)))
    best = None
    r = 8
    limit = min(n, target_rows)
    while r <= limit:
        if n % r == 0:
            best = r
        r += 8
    return best if best is not None else n


def quaternion_batch_norm(x, gamma, beta, running_mean, running_var,
                          momentum=MOMENTUM, eps=EPS):
    """Training-mode QuaternionBatchNorm forward.

    Returns (out, new_running_mean, new_running_var) — the stateful buffer
    updates of the PyTorch module are returned as explicit outputs.
    """
    n, c = x.shape
    f = c // 4
    gamma2 = gamma.reshape(1, f).astype(jnp.float32)
    beta2 = beta.reshape(1, c).astype(jnp.float32)
    rm2 = running_mean.reshape(1, c).astype(jnp.float32)
    rv2 = running_var.reshape(1, f).astype(jnp.float32)

    tn = _choose_tile_rows(n, c, jnp.dtype(x.dtype).itemsize)
    grid_n = n // tn

    reduce_kernel = functools.partial(
        _qbn_reduce_kernel, n_total=float(n), momentum=float(momentum),
        eps=float(eps))

    # Pass 1: batch reduction (accumulator outputs resident across the grid).
    scale_c, new_rm, new_rv = pl.pallas_call(
        reduce_kernel,
        grid=(grid_n,),
        in_specs=[
            pl.BlockSpec((tn, c), lambda i: (i, 0)),   # x tiles
            pl.BlockSpec((1, f), lambda i: (0, 0)),    # gamma (resident)
            pl.BlockSpec((1, c), lambda i: (0, 0)),    # running_mean (resident)
            pl.BlockSpec((1, f), lambda i: (0, 0)),    # running_var (resident)
        ],
        out_specs=[
            pl.BlockSpec((1, c), lambda i: (0, 0)),    # fused scale
            pl.BlockSpec((1, c), lambda i: (0, 0)),    # new running_mean
            pl.BlockSpec((1, f), lambda i: (0, 0)),    # new running_var
        ],
        out_shape=[
            jax.ShapeDtypeStruct((1, c), jnp.float32),
            jax.ShapeDtypeStruct((1, c), jnp.float32),
            jax.ShapeDtypeStruct((1, f), jnp.float32),
        ],
        scratch_shapes=[pltpu.VMEM((1, c), jnp.float32),   # sum(x)
                        pltpu.VMEM((1, c), jnp.float32)],  # sum(x^2)
        compiler_params=pltpu.CompilerParams(
            dimension_semantics=("arbitrary",),        # batch axis is a reduction
            vmem_limit_bytes=_VMEM_LIMIT_BYTES),
    )(x, gamma2, rm2, rv2)

    # Pass 2: normalize — independent tiles, parallel grid (both TCs on v7x).
    out = pl.pallas_call(
        _qbn_normalize_kernel,
        grid=(grid_n,),
        in_specs=[
            pl.BlockSpec((1, c), lambda i: (0, 0)),    # fused scale (resident)
            pl.BlockSpec((1, c), lambda i: (0, 0)),    # beta (resident)
            pl.BlockSpec((tn, c), lambda i: (i, 0)),   # x tiles
        ],
        out_specs=pl.BlockSpec((tn, c), lambda i: (i, 0)),
        out_shape=jax.ShapeDtypeStruct((n, c), x.dtype),
        compiler_params=pltpu.CompilerParams(
            dimension_semantics=("parallel",),
            vmem_limit_bytes=_VMEM_LIMIT_BYTES),
    )(scale_c, beta2, x)

    return out, new_rm.reshape(c), new_rv.reshape(f)


def _reference(x, gamma, beta, running_mean, running_var,
               momentum=MOMENTUM, eps=EPS):
    """Pure-JAX reference mirroring the PyTorch training-mode forward."""
    mu = jnp.mean(x, axis=0)
    delta = x - mu
    d_r, d_i, d_j, d_k = jnp.split(delta, 4, axis=-1)
    quat_var = jnp.mean(d_r ** 2 + d_i ** 2 + d_j ** 2 + d_k ** 2, axis=0)
    denom = jnp.sqrt(quat_var + eps)
    out = x / jnp.concatenate([denom] * 4, axis=-1)
    q_gamma = jnp.concatenate([gamma] * 4, axis=-1)
    out = q_gamma * out + beta
    new_rm = (1 - momentum) * running_mean + momentum * mu
    new_rv = (1 - momentum) * running_var + momentum * quat_var
    return out, new_rm, new_rv


if __name__ == "__main__":
    key = jax.random.PRNGKey(0)

    # (batch, input_size): small docstring-like shape plus a multi-tile shape
    # that exercises the pipelined reduction grid (grid_n > 1).
    for batch, input_size in [(8, 32), (2048, 256)]:
        num_features = input_size // 4
        key, sub = jax.random.split(key)
        x = jax.random.normal(sub, (batch, input_size), dtype=jnp.float32)

        # Deterministic parameter init exactly as in __init__ of the module.
        gamma = jnp.full((num_features,), GAMMA_INIT, dtype=jnp.float32)
        beta = jnp.zeros((input_size,), dtype=jnp.float32)
        running_mean = jnp.zeros((input_size,), dtype=jnp.float32)
        running_var = jnp.ones((num_features,), dtype=jnp.float32)

        out, new_rm, new_rv = quaternion_batch_norm(
            x, gamma, beta, running_mean, running_var)
        jax.block_until_ready((out, new_rm, new_rv))

        ref_out, ref_rm, ref_rv = _reference(
            x, gamma, beta, running_mean, running_var)
        assert jnp.allclose(out, ref_out, atol=1e-4, rtol=1e-4)
        assert jnp.allclose(new_rm, ref_rm, atol=1e-4, rtol=1e-4)
        assert jnp.allclose(new_rv, ref_rv, atol=1e-4, rtol=1e-4)

    print("KERNEL_OK")
</pallas_src>

<mosaic_0001>
module attributes {stable_mosaic.version = 11 : i64} {
  func.func @_qbn_reduce_kernel(%arg0: i32, %arg1: memref<8x32xf32, #tpu.memory_space<vmem>>, %arg2: memref<1x8xf32, #tpu.memory_space<vmem>>, %arg3: memref<1x32xf32, #tpu.memory_space<vmem>>, %arg4: memref<1x8xf32, #tpu.memory_space<vmem>>, %arg5: memref<1x32xf32, #tpu.memory_space<vmem>>, %arg6: memref<1x32xf32, #tpu.memory_space<vmem>>, %arg7: memref<1x8xf32, #tpu.memory_space<vmem>>, %arg8: memref<1x32xf32, #tpu.memory_space<vmem>>, %arg9: memref<1x32xf32, #tpu.memory_space<vmem>>) attributes {dimension_semantics = [#tpu.dimension_semantics<arbitrary>], iteration_bounds = array<i64: 1>, scalar_prefetch = 0 : i64, scratch_operands = 2 : i64, tpu.core_type = #tpu.core_type<tc>, window_params = [{transform_indices = @transform_0, window_bounds = array<i64: 8, 32>}, {pipeline_mode = #tpu.pipeline_mode<synchronous>, transform_indices = @transform_1, window_bounds = array<i64: 1, 8>}, {pipeline_mode = #tpu.pipeline_mode<synchronous>, transform_indices = @transform_2, window_bounds = array<i64: 1, 32>}, {pipeline_mode = #tpu.pipeline_mode<synchronous>, transform_indices = @transform_3, window_bounds = array<i64: 1, 8>}, {pipeline_mode = #tpu.pipeline_mode<synchronous>, transform_indices = @transform_4, window_bounds = array<i64: 1, 32>}, {pipeline_mode = #tpu.pipeline_mode<synchronous>, transform_indices = @transform_5, window_bounds = array<i64: 1, 32>}, {pipeline_mode = #tpu.pipeline_mode<synchronous>, transform_indices = @transform_6, window_bounds = array<i64: 1, 8>}]} {
    %c0_i32 = arith.constant 0 : i32
    %0 = arith.cmpi eq, %arg0, %c0_i32 : i32
    %1 = arith.extui %0 : i1 to i32
    %c0_i32_0 = arith.constant 0 : i32
    %2 = arith.cmpi ne, %1, %c0_i32_0 : i32
    scf.if %2 {
      %cst_13 = arith.constant 0.000000e+00 : f32
      %18 = vector.broadcast %cst_13 : f32 to vector<1x32xf32>
      %c0_14 = arith.constant 0 : index
      %c0_15 = arith.constant 0 : index
      %19 = vector.load %arg8[%c0_14, %c0_15] : memref<1x32xf32, #tpu.memory_space<vmem>>, vector<1x32xf32>
      tpu.vector_store %arg8[%c0_14, %c0_15], %18 {strides = array<i32>} : memref<1x32xf32, #tpu.memory_space<vmem>>, vector<1x32xf32>,
      %cst_16 = arith.constant 0.000000e+00 : f32
      %20 = vector.broadcast %cst_16 : f32 to vector<1x32xf32>
      %c0_17 = arith.constant 0 : index
      %c0_18 = arith.constant 0 : index
      %21 = vector.load %arg9[%c0_17, %c0_18] : memref<1x32xf32, #tpu.memory_space<vmem>>, vector<1x32xf32>
      tpu.vector_store %arg9[%c0_17, %c0_18], %20 {strides = array<i32>} : memref<1x32xf32, #tpu.memory_space<vmem>>, vector<1x32xf32>,
    } else {
    }
    %c0 = arith.constant 0 : index
    %c0_1 = arith.constant 0 : index
    %3 = vector.load %arg1[%c0, %c0_1] : memref<8x32xf32, #tpu.memory_space<vmem>>, vector<8x32xf32>
    %c0_2 = arith.constant 0 : index
    %c0_3 = arith.constant 0 : index
    %4 = vector.load %arg8[%c0_2, %c0_3] : memref<1x32xf32, #tpu.memory_space<vmem>>, vector<1x32xf32>
    %cst = arith.constant dense<0.000000e+00> : vector<32xf32>
    %5 = vector.multi_reduction <add>, %3, %cst [0] : vector<8x32xf32> to vector<32xf32>
    %6 = vector.shape_cast %5 : vector<32xf32> to vector<1x32xf32>
    %7 = arith.addf %4, %6 : vector<1x32xf32>
    %c0_4 = arith.constant 0 : index
    %c0_5 = arith.constant 0 : index
    %8 = vector.load %arg8[%c0_4, %c0_5] : memref<1x32xf32, #tpu.memory_space<vmem>>, vector<1x32xf32>
    tpu.vector_store %arg8[%c0_4, %c0_5], %7 {strides = array<i32>} : memref<1x32xf32, #tpu.memory_space<vmem>>, vector<1x32xf32>,
    %c0_6 = arith.constant 0 : index
    %c0_7 = arith.constant 0 : index
    %9 = vector.load %arg9[%c0_6, %c0_7] : memref<1x32xf32, #tpu.memory_space<vmem>>, vector<1x32xf32>
    %10 = arith.mulf %3, %3 : vector<8x32xf32>
    %cst_8 = arith.constant dense<0.000000e+00> : vector<32xf32>
    %11 = vector.multi_reduction <add>, %10, %cst_8 [0] : vector<8x32xf32> to vector<32xf32>
    %12 = vector.shape_cast %11 : vector<32xf32> to vector<1x32xf32>
    %13 = arith.addf %9, %12 : vector<1x32xf32>
    %c0_9 = arith.constant 0 : index
    %c0_10 = arith.constant 0 : index
    %14 = vector.load %arg9[%c0_9, %c0_10] : memref<1x32xf32, #tpu.memory_space<vmem>>, vector<1x32xf32>
    tpu.vector_store %arg9[%c0_9, %c0_10], %13 {strides = array<i32>} : memref<1x32xf32, #tpu.memory_space<vmem>>, vector<1x32xf32>,
    %c0_i32_11 = arith.constant 0 : i32
    %15 = arith.cmpi eq, %arg0, %c0_i32_11 : i32
    %16 = arith.extui %15 : i1 to i32
    %c0_i32_12 = arith.constant 0 : i32
    %17 = arith.cmpi ne, %16, %c0_i32_12 : i32
    scf.if %17 {
      %c0_13 = arith.constant 0 : index
      %c0_14 = arith.constant 0 : index
      %18 = vector.load %arg8[%c0_13, %c0_14] : memref<1x32xf32, #tpu.memory_space<vmem>>, vector<1x32xf32>
      %cst_15 = arith.constant 1.250000e-01 : f32
      %19 = vector.broadcast %cst_15 : f32 to vector<1x32xf32>
      %20 = arith.mulf %18, %19 : vector<1x32xf32>
      %c0_16 = arith.constant 0 : index
      %c0_17 = arith.constant 0 : index
      %21 = vector.load %arg9[%c0_16, %c0_17] : memref<1x32xf32, #tpu.memory_space<vmem>>, vector<1x32xf32>
      %cst_18 = arith.constant 1.250000e-01 : f32
      %22 = vector.broadcast %cst_18 : f32 to vector<1x32xf32>
      %23 = arith.mulf %21, %22 : vector<1x32xf32>
      %24 = arith.mulf %20, %20 : vector<1x32xf32>
      %25 = arith.subf %23, %24 : vector<1x32xf32>
      %26 = vector.extract_strided_slice %25 {offsets = [0, 0], sizes = [1, 8], strides = [1, 1]} : vector<1x32xf32> to vector<1x8xf32>
      %27 = vector.extract_strided_slice %25 {offsets = [0, 8], sizes = [1, 8], strides = [1, 1]} : vector<1x32xf32> to vector<1x8xf32>
      %28 = arith.addf %26, %27 : vector<1x8xf32>
      %29 = vector.extract_strided_slice %25 {offsets = [0, 16], sizes = [1, 8], strides = [1, 1]} : vector<1x32xf32> to vector<1x8xf32>
      %30 = arith.addf %28, %29 : vector<1x8xf32>
      %31 = vector.extract_strided_slice %25 {offsets = [0, 24], sizes = [1, 8], strides = [1, 1]} : vector<1x32xf32> to vector<1x8xf32>
      %32 = arith.addf %30, %31 : vector<1x8xf32>
      %c0_19 = arith.constant 0 : index
      %c0_20 = arith.constant 0 : index
      %33 = vector.load %arg2[%c0_19, %c0_20] : memref<1x8xf32, #tpu.memory_space<vmem>>, vector<1x8xf32>
      %cst_21 = arith.constant 9.99999974E-5 : f32
      %34 = vector.broadcast %cst_21 : f32 to vector<1x8xf32>
      %35 = arith.addf %32, %34 : vector<1x8xf32>
      %36 = math.rsqrt %35 : vector<1x8xf32>
      %37 = arith.mulf %33, %36 : vector<1x8xf32>
      %38 = tpu.concatenate %37, %37, %37, %37 in 1 : vector<1x8xf32>, vector<1x8xf32>, vector<1x8xf32>, vector<1x8xf32> -> vector<1x32xf32>
      %c0_22 = arith.constant 0 : index
      %c0_23 = arith.constant 0 : index
      %39 = vector.load %arg5[%c0_22, %c0_23] : memref<1x32xf32, #tpu.memory_space<vmem>>, vector<1x32xf32>
      tpu.vector_store %arg5[%c0_22, %c0_23], %38 {strides = array<i32>} : memref<1x32xf32, #tpu.memory_space<vmem>>, vector<1x32xf32>,
      %c0_24 = arith.constant 0 : index
      %c0_25 = arith.constant 0 : index
      %40 = vector.load %arg3[%c0_24, %c0_25] : memref<1x32xf32, #tpu.memory_space<vmem>>, vector<1x32xf32>
      %cst_26 = arith.constant 0.899999976 : f32
      %41 = vector.broadcast %cst_26 : f32 to vector<1x32xf32>
      %42 = arith.mulf %41, %40 : vector<1x32xf32>
      %cst_27 = arith.constant 1.000000e-01 : f32
      %43 = vector.broadcast %cst_27 : f32 to vector<1x32xf32>
      %44 = arith.mulf %43, %20 : vector<1x32xf32>
      %45 = arith.addf %42, %44 : vector<1x32xf32>
      %c0_28 = arith.constant 0 : index
      %c0_29 = arith.constant 0 : index
      %46 = vector.load %arg6[%c0_28, %c0_29] : memref<1x32xf32, #tpu.memory_space<vmem>>, vector<1x32xf32>
      tpu.vector_store %arg6[%c0_28, %c0_29], %45 {strides = array<i32>} : memref<1x32xf32, #tpu.memory_space<vmem>>, vector<1x32xf32>,
      %c0_30 = arith.constant 0 : index
      %c0_31 = arith.constant 0 : index
      %47 = vector.load %arg4[%c0_30, %c0_31] : memref<1x8xf32, #tpu.memory_space<vmem>>, vector<1x8xf32>
      %cst_32 = arith.constant 0.899999976 : f32
      %48 = vector.broadcast %cst_32 : f32 to vector<1x8xf32>
      %49 = arith.mulf %48, %47 : vector<1x8xf32>
      %cst_33 = arith.constant 1.000000e-01 : f32
      %50 = vector.broadcast %cst_33 : f32 to vector<1x8xf32>
      %51 = arith.mulf %50, %32 : vector<1x8xf32>
      %52 = arith.addf %49, %51 : vector<1x8xf32>
      %c0_34 = arith.constant 0 : index
      %c0_35 = arith.constant 0 : index
      %53 = vector.load %arg7[%c0_34, %c0_35] : memref<1x8xf32, #tpu.memory_space<vmem>>, vector<1x8xf32>
      tpu.vector_store %arg7[%c0_34, %c0_35], %52 {strides = array<i32>} : memref<1x8xf32, #tpu.memory_space<vmem>>, vector<1x8xf32>,
    } else {
    }
    return
  }
  func.func @transform_0(%arg0: i32) -> (i32, i32) {
    %c0_i32 = arith.constant 0 : i32
    %c0_i32_0 = arith.constant 0 : i32
    return %arg0, %c0_i32 : i32, i32
  }
  func.func @transform_1(%arg0: i32) -> (i32, i32) {
    %c0_i32 = arith.constant 0 : i32
    %c0_i32_0 = arith.constant 0 : i32
    %c0_i32_1 = arith.constant 0 : i32
    return %c0_i32, %c0_i32_0 : i32, i32
  }
  func.func @transform_2(%arg0: i32) -> (i32, i32) {
    %c0_i32 = arith.constant 0 : i32
    %c0_i32_0 = arith.constant 0 : i32
    %c0_i32_1 = arith.constant 0 : i32
    return %c0_i32, %c0_i32_0 : i32, i32
  }
  func.func @transform_3(%arg0: i32) -> (i32, i32) {
    %c0_i32 = arith.constant 0 : i32
    %c0_i32_0 = arith.constant 0 : i32
    %c0_i32_1 = arith.constant 0 : i32
    return %c0_i32, %c0_i32_0 : i32, i32
  }
  func.func @transform_4(%arg0: i32) -> (i32, i32) {
    %c0_i32 = arith.constant 0 : i32
    %c0_i32_0 = arith.constant 0 : i32
    %c0_i32_1 = arith.constant 0 : i32
    return %c0_i32, %c0_i32_0 : i32, i32
  }
  func.func @transform_5(%arg0: i32) -> (i32, i32) {
    %c0_i32 = arith.constant 0 : i32
    %c0_i32_0 = arith.constant 0 : i32
    %c0_i32_1 = arith.constant 0 : i32
    return %c0_i32, %c0_i32_0 : i32, i32
  }
  func.func @transform_6(%arg0: i32) -> (i32, i32) {
    %c0_i32 = arith.constant 0 : i32
    %c0_i32_0 = arith.constant 0 : i32
    %c0_i32_1 = arith.constant 0 : i32
    return %c0_i32, %c0_i32_0 : i32, i32
  }
}

</mosaic_0001>

<bundles_post_ra>
// kernel: tpu_custom_call.1
= control target key start
LH: loop header
LB: loop body
LE: loop exit
PB: predicated region body
PF: predicated region fallthrough
CT: control target
= control target key end

     0   :  { %12 = vsyncpa [#allocation5], 0  ;;  %s410_s0 = inlined_call_operand.hbm [shape: f32[8,32], index: 0, kind: input, shape index: {}]   ;;  %s411_s1 = inlined_call_operand.hbm [shape: f32[1,8], index: 1, kind: input, shape index: {}]   ;;  %s412_s2 = inlined_call_operand.vmem [shape: f32[1,32], index: 2, kind: input, shape index: {}]   ;;  %s413_s3 = inlined_call_operand.vmem [shape: f32[1,8], index: 3, kind: input, shape index: {}]   ;;  %s414_s4 = inlined_call_operand.hbm [shape: f32[1,32], index: 4, kind: output, shape index: {0}]   ;;  %s415_s5 = inlined_call_operand.hbm [shape: f32[1,32], index: 5, kind: output, shape index: {1}]   ;;  %s416_s6 = inlined_call_operand.hbm [shape: f32[1,8], index: 6, kind: output, shape index: {2}]  }
   0x1   :  { %13 = vsyncpa [#allocation8], 0 }
   0x2   :  { %14 = vsyncpa [#allocation6], 0 }
   0x3   :  { %15 = vsyncpa [#allocation11], 0  ;;  %s21_s23 = sshll.u32 %s410_s0, 4  ;;  %s336_s24 = smov [#allocation4]   ;;  %s22_s23 = int_to_ptr.hbm [resolvable:$true] %s21_s23 }
   0x4   :  { %s23_s25 = sshll.u32 %s336_s24, 4  ;;  %s32_s28 = sshll.u32 %s411_s1, 4  ;;  %s24_s25 = int_to_ptr.vmem [resolvable:$true] %s23_s25  ;;  %s33_s28 = int_to_ptr.hbm [resolvable:$true] %s32_s28 }
   0x5   :  { %26 = dma.hbm_to_vmem [thread:$0]  %s22_s23, 128, %s24_s25, [#allocation5]  }
   0x6   :  { %s337_s29 = smov [#allocation7]  }
   0x7   :  { %s34_s30 = sshll.u32 %s337_s29, 4  ;;  %s35_s30 = int_to_ptr.vmem [resolvable:$true] %s34_s30 }
   0x8   :  { %37 = dma.hbm_to_vmem [thread:$0]  %s33_s28, 16, %s35_s30, [#allocation8]  }
   0x9   :  { %328 = dma.done.wait [#allocation5], 128  }
   0xa   :  { %329 = vsyncadd [#allocation5], 4294967168 }
   0xb   :  { %330 = dma.done.wait [#allocation8], 16  }
   0xc   :  { %331 = vsyncadd [#allocation8], 4294967280  ;;  %vm54_vm0 = vcmask 253952   ;;  %v338_v0 = vmov 0.0   ;;  %vm59_vm1 = vcmask 261120   ;;  %v57_v1 = vld [vmem:[#allocation4] sm:$0xff] }
   0xd   :  { %55 = vst.msk [vmem:[#allocation2] sm:$0x1] %vm54_vm0, %v338_v0  ;;  %v60_v2 = vsel %vm59_vm1, %v57_v1, 0.0  ;;  %v71_v3 = vmul.f32 %v57_v1, %v57_v1  ;;  %s339_s0 = smov 120   ;;  %s340_s1 = smov 104   ;;  %vm143_vm2 = vcmask 57344  }
   0xe   :  { %56 = vst.msk [vmem:[#allocation3] sm:$0x1] %vm54_vm0, %v338_v0  ;;  %v61_v4 = vrot.slane %v60_v2, 4  ;;  %s341_s7 = smov 112   ;;  %v139_v30 = vld [vmem:[%s413_s3] sm:$0x1] }
   0xf   :  { %v72_v5 = vsel %vm59_vm1, %v71_v3, 0.0  ;;  %v140_v33 = vmul.f32 0.9, %v139_v30  ;;  %v103_v43 = vld [vmem:[#allocation7] sm:$0x1]  ;;  %s342_s3 = smov 16  }
  0x10   :  { %v62_v6 = vadd.f32 %v61_v4, %v60_v2  ;;  %v73_v7 = vrot.slane %v72_v5, 4  ;;  %s343_s10 = smov 8   ;;  %s344_s11 = smov 24   ;;  %v134_v48 = vld [vmem:[%s412_s2] sm:$0x1]  ;;  %vm127_vm6 = vcmask 64512  }
  0x11   :  { %s345_s14 = smov [#allocation10]   ;;  %s163_s18 = sshll.u32 %s415_s5, 4  ;;  %v135_v49 = vmul.f32 0.9, %v134_v48  ;;  %vm129_vm7 = vcmask 130048   ;;  %vm131_vm8 = vcmask 195584   ;;  %s164_s18 = int_to_ptr.hbm [resolvable:$true] %s163_s18 }
  0x12   :  { %v63_v8 = vrot.slane %v62_v6, 2  ;;  %v74_v9 = vadd.f32 %v73_v7, %v72_v5  ;;  %s161_s15 = sshll.u32 %s345_s14, 4  ;;  %s346_s19 = smov [#allocation12]   ;;  %s162_s15 = int_to_ptr.vmem [resolvable:$true] %s161_s15 }
  0x13   :  { %s172_s20 = sshll.u32 %s346_s19, 4  ;;  %s174_s23 = sshll.u32 %s416_s6, 4  ;;  %s173_s20 = int_to_ptr.vmem [resolvable:$true] %s172_s20  ;;  %s175_s23 = int_to_ptr.hbm [resolvable:$true] %s174_s23 }
  0x14   :  { %v64_v10 = vadd.f32 %v63_v8, %v62_v6  ;;  %v75_v11 = vrot.slane %v74_v9, 2  ;;  %v58_v14 = vld [vmem:[#allocation2] sm:$0x1]  ;;  %s347_s2 = smov [#allocation9]   ;;  %s152_s26 = sshll.u32 %s414_s4, 4  ;;  %s153_s26 = int_to_ptr.hbm [resolvable:$true] %s152_s26 }
  0x15   :  { %v70_v17 = vld [vmem:[#allocation3] sm:$0x1]  ;;  %s150_s5 = sshll.u32 %s347_s2, 4  ;;  %s151_s5 = int_to_ptr.vmem [resolvable:$true] %s150_s5 }
  0x16   :  { %v65_v12 = vrot.slane %v64_v10, 1  ;;  %v76_v13 = vadd.f32 %v75_v11, %v74_v9 }
  0x18   :  { %v66_v15 = vadd.f32 %v65_v12, %v64_v10  ;;  %v77_v16 = vrot.slane %v76_v13, 1 }
  0x1a   :  { %v67_v18 = vadd.f32 %v66_v15, %v58_v14  ;;  %v78_v19 = vadd.f32 %v77_v16, %v76_v13 }
  0x1c   :  { %69 = vst.msk [vmem:[#allocation2] sm:$0x1] %vm54_vm0, %v67_v18  ;;  %v79_v20 = vadd.f32 %v78_v19, %v70_v17 }
  0x1e   :  { %80 = vst.msk [vmem:[#allocation3] sm:$0x1] %vm54_vm0, %v79_v20 }
  0x23   :  { %v84_v21 = vld [vmem:[#allocation2] sm:$0x1] }
  0x24   :  { %v85_v22 = vmul.f32 0.125, %v84_v21 }
  0x25   :  { %v86_v23 = vld [vmem:[#allocation3] sm:$0x1] }
  0x26   :  { %v87_v24 = vmul.f32 0.125, %v86_v23  ;;  %v88_v25 = vmul.f32 %v85_v22, %v85_v22  ;;  %v136_v50 = vmul.f32 0.1, %v85_v22 }
  0x28   :  { %v89_v26 = vsub.f32 %v87_v24, %v88_v25  ;;  %v137_v51 = vadd.f32 %v136_v50, %v135_v49 }
  0x2a   :  { %91 = vrot.lane.b32.xlu0 %v89_v26, %s339_s0  ;;  %99 = vrot.lane.b32.xlu1 %v89_v26, %s340_s1  ;;  %138 = vst.msk [vmem:[#allocation10] sm:$0x1] %vm54_vm0, %v137_v51 }
  0x2b   :  { %166 = dma.vmem_to_hbm [thread:$0]  %s162_s15, 16, %s164_s18, [#allocation11]  }
  0x32   :  { %95 = vrot.lane.b32.xlu0 %v89_v26, %s341_s7 }
  0x9c   :  { %v92_v27 = vpop.permute.xlu0 %91  ;;  %v100_v31 = vpop.permute.xlu1 %99 }
  0x9d   :  { %v94_v28 = vadd.f32 %v92_v27, %v89_v26 }
  0xa4   :  { %v96_v29 = vpop.permute.xlu0 %95 }
  0xa5   :  { %v98_v32 = vadd.f32 %v96_v29, %v94_v28 }
  0xa7   :  { %v102_v34 = vadd.f32 %v100_v31, %v98_v32 }
  0xa9   :  { %v104_v35 = vadd.f32 0.0001, %v102_v34  ;;  %v141_v36 = vmul.f32 0.1, %v102_v34 }
  0xab   :  { %206 = vrsqrt.f32 %v104_v35  ;;  %v142_v37 = vadd.f32 %v141_v36, %v140_v33  ;;  %vm111_vm4 = vweird.f32 %v104_v35 }
  0xad   :  { %144 = vst.msk [vmem:[#allocation12] sm:$0x1] %vm143_vm2, %v142_v37 }
  0xae   :  { %177 = dma.vmem_to_hbm [thread:$0]  %s173_s20, 16, %s175_s23, [#allocation11]  }
  0xb1   :  { %v207_v38 = vpop.eup %206 }
  0xb2   :  { %v106_v39 = vmul.f32 %v207_v38, %v104_v35  ;;  %vm112_vm3 = vweird.f32 %v207_v38 }
  0xb3   :  { %vm113_vm5 = vmor %vm111_vm4, %vm112_vm3 }
  0xb4   :  { %v107_v40 = vmul.f32 %v207_v38, %v106_v39 }
  0xb6   :  { %v108_v41 = vmul.f32 0.5, %v107_v40 }
  0xb8   :  { %v109_v42 = vsub.f32 1.5, %v108_v41 }
  0xba   :  { %v110_v44 = vmul.f32 %v207_v38, %v109_v42 }
  0xbc   :  { %v114_v45 = vsel %vm113_vm5, %v207_v38, %v110_v44 }
  0xbd   :  { %v115_v46 = vmul.f32 %v114_v45, %v103_v43 }
  0xbf   :  { %v117_v47 = vperm.slane %v115_v46, 0 }
  0xc1   :  { %121 = vrot.lane.b32.xlu2 %v117_v47, %s342_s3  ;;  %118 = vrot.lane.b32.xlu1 %v117_v47, %s343_s10 }
  0xc9   :  { %124 = vrot.lane.b32.xlu2 %v117_v47, %s344_s11 }
 0x11b   :  { %v122_v52 = vpop.permute.xlu2 %121 }
 0x123   :  { %v125_v55 = vpop.permute.xlu2 %124 }
 0x133   :  { %v119_v53 = vpop.permute.xlu1 %118 }
 0x134   :  { %v128_v54 = vsel %vm127_vm6, %v115_v46, %v119_v53 }
 0x135   :  { %v130_v56 = vsel %vm129_vm7, %v128_v54, %v122_v52 }
 0x136   :  { %v132_v57 = vsel %vm131_vm8, %v130_v56, %v125_v55 }
 0x137   :  { %133 = vst.msk [vmem:[#allocation9] sm:$0x1] %vm54_vm0, %v132_v57 }
 0x138   :  { %155 = dma.vmem_to_hbm [thread:$0]  %s151_s5, 16, %s153_s26, [#allocation6]  }
 0x139   :  { %332 = dma.done.wait [#allocation6], 16  }
 0x13a   :  { %333 = vsyncadd [#allocation6], 4294967280 }
 0x13b   :  { %334 = dma.done.wait [#allocation11], 32  }
 0x13c   :  { %335 = vsyncadd [#allocation11], 4294967264 }
 0x13d   :  { %190 = vsyncpa [#allocation5], 1 }
 0x13e   :  { %191 = vsyncpa [#allocation8], 1 }
 0x13f   :  { %192 = vsyncpa [#allocation6], 1 }
 0x140   :  { %193 = vsyncpa [#allocation11], 1 }

</bundles_post_ra>
